<compile_context>
chip_gen: v7x
topology: tpu7x:2x2x1
jax: 0.10.0
libtpu: 0.0.40
codegen_flags: <defaults>
</compile_context>

<pallas_src>
import math
from functools import partial

import jax
import jax.numpy as jnp
from jax.experimental import pallas as pl
from jax.experimental.pallas import tpu as pltpu


def _linear_kernel(x_ref, w_ref, b_ref, o_ref, acc_ref):
    # grid = (M_tiles, N_tiles, K_tiles); K is the last ('arbitrary') axis.
    k = pl.program_id(2)

    @pl.when(k == 0)
    def _():
        acc_ref[...] = jnp.zeros_like(acc_ref)

    # MXU matmul with f32 accumulation; operands are bf16 tiles.
    acc_ref[...] += jnp.dot(
        x_ref[...], w_ref[...], preferred_element_type=jnp.float32
    )

    # Epilogue only on the final K step: bias add in f32, then cast + store.
    @pl.when(k == pl.num_programs(2) - 1)
    def _():
        o_ref[...] = (acc_ref[...] + b_ref[...]).astype(o_ref.dtype)


def _round_up(a, m):
    return ((a + m - 1) // m) * m


@partial(jax.jit, static_argnames=("compute_dtype", "tm", "tn", "tk"))
def linear_classifier_forward(x, weight, bias, *, compute_dtype=jnp.bfloat16,
                              tm=None, tn=None, tk=None):
    """x: (B, num_inputs), weight: (num_outputs, num_inputs) [torch layout],
    bias: (num_outputs,).  Returns logits (B, num_outputs) in x.dtype."""
    B, K = x.shape
    N, Kw = weight.shape
    assert Kw == K, "weight shape must be (num_outputs, num_inputs)"
    out_dtype = x.dtype

    # Generation-safe tile sizes: lane dims multiples of 128, sublane of 8.
    # Max tiles kept modest (<= ~4 MiB with double buffering) so they fit the
    # scoped VMEM default on all of v5e/v6e/v7x.
    tm = tm if tm is not None else min(_round_up(B, 8), 256)
    tn = tn if tn is not None else min(_round_up(N, 128), 512)
    tk = tk if tk is not None else min(_round_up(K, 128), 512)

    # Pad to tile multiples (zero padding does not change X @ W.T + b).
    Bp, Kp, Np = _round_up(B, tm), _round_up(K, tk), _round_up(N, tn)

    xp = jnp.zeros((Bp, Kp), compute_dtype).at[:B, :K].set(
        x.astype(compute_dtype))
    # Pre-transpose the weight once (outside the kernel): (K, N) layout.
    wp = jnp.zeros((Kp, Np), compute_dtype).at[:K, :N].set(
        weight.T.astype(compute_dtype))
    bp = jnp.zeros((1, Np), jnp.float32).at[0, :N].set(
        bias.astype(jnp.float32))

    grid = (Bp // tm, Np // tn, Kp // tk)

    itemsize = jnp.dtype(compute_dtype).itemsize
    cost = pl.CostEstimate(
        flops=2 * Bp * Kp * Np,
        transcendentals=0,
        bytes_accessed=(Bp * Kp + Kp * Np) * itemsize
        + Np * 4
        + Bp * Np * jnp.dtype(out_dtype).itemsize,
    )

    out_padded = pl.pallas_call(
        _linear_kernel,
        out_shape=jax.ShapeDtypeStruct((Bp, Np), out_dtype),
        grid_spec=pltpu.PrefetchScalarGridSpec(
            num_scalar_prefetch=0,
            grid=grid,
            in_specs=[
                pl.BlockSpec((tm, tk), lambda i, j, k: (i, k)),   # X tile
                pl.BlockSpec((tk, tn), lambda i, j, k: (k, j)),   # W^T tile
                pl.BlockSpec((1, tn), lambda i, j, k: (0, j)),    # bias tile
            ],
            out_specs=pl.BlockSpec((tm, tn), lambda i, j, k: (i, j)),
            scratch_shapes=[pltpu.VMEM((tm, tn), jnp.float32)],
        ),
        compiler_params=pltpu.CompilerParams(
            dimension_semantics=("parallel", "parallel", "arbitrary"),
            vmem_limit_bytes=32 * 1024 * 1024,  # safe headroom on v5e/v6e/v7x
        ),
        cost_estimate=cost,
    )(xp, wp, bp)

    return out_padded[:B, :N]


def init_params(key, num_inputs, num_outputs, dtype=jnp.float32):
    """Matches the PyTorch module:
    - weight: xavier_uniform (gain=1)  -> U(-a, a), a = sqrt(6/(fan_in+fan_out))
    - bias:   torch.nn.Linear default  -> U(-1/sqrt(fan_in), 1/sqrt(fan_in))
    """
    kw, kb = jax.random.split(key)
    a = math.sqrt(6.0 / (num_inputs + num_outputs))
    weight = jax.random.uniform(kw, (num_outputs, num_inputs), dtype,
                                minval=-a, maxval=a)
    bound = 1.0 / math.sqrt(num_inputs)
    bias = jax.random.uniform(kb, (num_outputs,), dtype,
                              minval=-bound, maxval=bound)
    return weight, bias


if __name__ == "__main__":
    # NOTE: at these toy shapes a Pallas kernel is pure launch/step overhead
    # and plain XLA dot+add would win; shapes kept small for the sanity run.
    key = jax.random.PRNGKey(0)
    k_x, k_p = jax.random.split(key)

    batch, num_inputs, num_outputs = 8, 32, 16
    x = jax.random.normal(k_x, (batch, num_inputs), jnp.float32)
    weight, bias = init_params(k_p, num_inputs, num_outputs)

    logits = linear_classifier_forward(x, weight, bias)
    jax.block_until_ready(logits)
    assert logits.shape == (batch, num_outputs)

    # Reference computed along the same numerical path (bf16 operands,
    # f32 accumulation), hence the modest tolerance.
    ref = (
        jnp.dot(x.astype(jnp.bfloat16), weight.T.astype(jnp.bfloat16),
                preferred_element_type=jnp.float32)
        + bias.astype(jnp.float32)
    ).astype(x.dtype)
    assert jnp.allclose(logits, ref, atol=2e-2, rtol=2e-2), \
        "mismatch vs reference"

    print("KERNEL_OK")
</pallas_src>

<mosaic_0001>
module attributes {stable_mosaic.version = 11 : i64} {
  func.func @_linear_kernel(%arg0: i32, %arg1: i32, %arg2: i32, %arg3: memref<8x128xbf16, #tpu.memory_space<vmem>>, %arg4: memref<128x128xbf16, #tpu.memory_space<vmem>>, %arg5: memref<1x128xf32, #tpu.memory_space<vmem>>, %arg6: memref<8x128xf32, #tpu.memory_space<vmem>>, %arg7: memref<8x128xf32, #tpu.memory_space<vmem>>) attributes {dimension_semantics = [#tpu.dimension_semantics<parallel>, #tpu.dimension_semantics<parallel>, #tpu.dimension_semantics<arbitrary>], iteration_bounds = array<i64: 1, 1, 1>, scalar_prefetch = 0 : i64, scratch_operands = 1 : i64, tpu.core_type = #tpu.core_type<tc>, window_params = [{transform_indices = @transform_0, window_bounds = array<i64: 8, 128>}, {transform_indices = @transform_1, window_bounds = array<i64: 128, 128>}, {transform_indices = @transform_2, window_bounds = array<i64: 1, 128>}, {transform_indices = @transform_3, window_bounds = array<i64: 8, 128>}]} {
    %c0_i32 = arith.constant 0 : i32
    %0 = arith.cmpi eq, %arg2, %c0_i32 : i32
    %1 = arith.extui %0 : i1 to i32
    %c0_i32_0 = arith.constant 0 : i32
    %2 = arith.cmpi ne, %1, %c0_i32_0 : i32
    scf.if %2 {
      %cst_10 = arith.constant 0.000000e+00 : f32
      %12 = vector.broadcast %cst_10 : f32 to vector<8x128xf32>
      %c0_11 = arith.constant 0 : index
      %c0_12 = arith.constant 0 : index
      %13 = vector.load %arg7[%c0_11, %c0_12] : memref<8x128xf32, #tpu.memory_space<vmem>>, vector<8x128xf32>
      tpu.vector_store %arg7[%c0_11, %c0_12], %12 {strides = array<i32>} : memref<8x128xf32, #tpu.memory_space<vmem>>, vector<8x128xf32>,
    } else {
    }
    %c0 = arith.constant 0 : index
    %c0_1 = arith.constant 0 : index
    %3 = vector.load %arg7[%c0, %c0_1] : memref<8x128xf32, #tpu.memory_space<vmem>>, vector<8x128xf32>
    %c0_2 = arith.constant 0 : index
    %c0_3 = arith.constant 0 : index
    %4 = vector.load %arg3[%c0_2, %c0_3] : memref<8x128xbf16, #tpu.memory_space<vmem>>, vector<8x128xbf16>
    %c0_4 = arith.constant 0 : index
    %c0_5 = arith.constant 0 : index
    %5 = vector.load %arg4[%c0_4, %c0_5] : memref<128x128xbf16, #tpu.memory_space<vmem>>, vector<128x128xbf16>
    %cst = arith.constant dense<0.000000e+00> : vector<8x128xf32>
    %6 = tpu.matmul %4, %5, %cst {dimension_numbers = #tpu.dot_dimension_numbers<[1], [0], [0], [1], [0, 0, 1, 1], [], []>} : vector<8x128xbf16>, vector<128x128xbf16>, vector<8x128xf32> -> vector<8x128xf32>
    %7 = arith.addf %3, %6 : vector<8x128xf32>
    %c0_6 = arith.constant 0 : index
    %c0_7 = arith.constant 0 : index
    %8 = vector.load %arg7[%c0_6, %c0_7] : memref<8x128xf32, #tpu.memory_space<vmem>>, vector<8x128xf32>
    tpu.vector_store %arg7[%c0_6, %c0_7], %7 {strides = array<i32>} : memref<8x128xf32, #tpu.memory_space<vmem>>, vector<8x128xf32>,
    %c0_i32_8 = arith.constant 0 : i32
    %9 = arith.cmpi eq, %arg2, %c0_i32_8 : i32
    %10 = arith.extui %9 : i1 to i32
    %c0_i32_9 = arith.constant 0 : i32
    %11 = arith.cmpi ne, %10, %c0_i32_9 : i32
    scf.if %11 {
      %c0_10 = arith.constant 0 : index
      %c0_11 = arith.constant 0 : index
      %12 = vector.load %arg7[%c0_10, %c0_11] : memref<8x128xf32, #tpu.memory_space<vmem>>, vector<8x128xf32>
      %c0_12 = arith.constant 0 : index
      %c0_13 = arith.constant 0 : index
      %13 = vector.load %arg5[%c0_12, %c0_13] : memref<1x128xf32, #tpu.memory_space<vmem>>, vector<1x128xf32>
      %14 = vector.broadcast %13 : vector<1x128xf32> to vector<8x128xf32>
      %15 = arith.addf %12, %14 : vector<8x128xf32>
      %c0_14 = arith.constant 0 : index
      %c0_15 = arith.constant 0 : index
      %16 = vector.load %arg6[%c0_14, %c0_15] : memref<8x128xf32, #tpu.memory_space<vmem>>, vector<8x128xf32>
      tpu.vector_store %arg6[%c0_14, %c0_15], %15 {strides = array<i32>} : memref<8x128xf32, #tpu.memory_space<vmem>>, vector<8x128xf32>,
    } else {
    }
    return
  }
  func.func @transform_0(%arg0: i32, %arg1: i32, %arg2: i32) -> (i32, i32) {
    %c0_i32 = arith.constant 0 : i32
    return %arg0, %arg2 : i32, i32
  }
  func.func @transform_1(%arg0: i32, %arg1: i32, %arg2: i32) -> (i32, i32) {
    %c0_i32 = arith.constant 0 : i32
    return %arg2, %arg1 : i32, i32
  }
  func.func @transform_2(%arg0: i32, %arg1: i32, %arg2: i32) -> (i32, i32) {
    %c0_i32 = arith.constant 0 : i32
    %c0_i32_0 = arith.constant 0 : i32
    return %c0_i32, %arg1 : i32, i32
  }
  func.func @transform_3(%arg0: i32, %arg1: i32, %arg2: i32) -> (i32, i32) {
    %c0_i32 = arith.constant 0 : i32
    return %arg0, %arg1 : i32, i32
  }
}

</mosaic_0001>

<bundles_post_ra>
// kernel: linear_classifier_forward.1
= control target key start
LH: loop header
LB: loop body
LE: loop exit
PB: predicated region body
PF: predicated region fallthrough
CT: control target
= control target key end

     0   :  { %v229_v1 = vmov 0.0   ;;  %vm230_vm0 = vmmov 0   ;;  %s294_s0 = inlined_call_operand.vmem [shape: bf16[8,128], index: 0, kind: input, shape index: {}]   ;;  %s295_s1 = inlined_call_operand.vmem [shape: bf16[128,128], index: 1, kind: input, shape index: {}]   ;;  %s296_s2 = inlined_call_operand.vmem [shape: f32[1,128], index: 2, kind: input, shape index: {}]   ;;  %s297_s3 = inlined_call_operand.hbm [shape: f32[8,128], index: 3, kind: output, shape index: {}]  }
   0x1   :  { %v197_v0 = vld [vmem:[%s295_s1] sm:$0xff]   ;;  %174 = vmatprep.subr.bf16.mxu0 %v229_v1  ;;  %v198_v2 = vld [vmem:[%s295_s1 + $0x8] sm:$0xff]   ;;  %190 = vmatprep.mubr.msk.bf16.mxu0 %vm230_vm0, %v229_v1  ;;  %v199_v3 = vld [vmem:[%s295_s1 + $0x10] sm:$0xff]  }
   0x2   :  { %175 = vmatpush3.bf16.msra.mxu0 %v197_v0 }
   0x3   :  { %176 = vmatprep.subr.bf16.mxu0 %v229_v1 }
   0x6   :  { %177 = vmatpush3.bf16.msra.mxu0 %v198_v2 }
   0x7   :  { %178 = vmatprep.subr.bf16.mxu0 %v229_v1 }
   0x8   :  { %8 = vsyncpa [#allocation4], 0  ;;  %v200_v4 = vld [vmem:[%s295_s1 + $0x18] sm:$0xff]   ;;  %v201_v5 = vld [vmem:[%s295_s1 + $0x20] sm:$0xff]   ;;  %s231_s5 = smov [#allocation3]  }
   0x9   :  { %v202_v6 = vld [vmem:[%s295_s1 + $0x28] sm:$0xff]   ;;  %v203_v7 = vld [vmem:[%s295_s1 + $0x30] sm:$0xff]   ;;  %v204_v8 = vld [vmem:[%s295_s1 + $0x38] sm:$0xff]   ;;  %s148_s6 = sshll.u32 %s231_s5, 4  ;;  %s149_s6 = int_to_ptr.vmem [resolvable:$true] %s148_s6 }
   0xa   :  { %179 = vmatpush3.bf16.msra.mxu0 %v199_v3  ;;  %v22_v9 = vld [vmem:[%s294_s0] sm:$0xf]  ;;  %s205_s1 = scalar_lea.vmem %s149_s6, 128  ;;  %p210_p1 = scmp.lt.s32.totalorder %s149_s6, %s149_s6 }
   0xb   :  { %180 = vmatprep.subr.bf16.mxu0 %v229_v1  ;;  %v164_v10 = vld [vmem:[%s296_s2] ss:$0 sm:$0xff]  ;;  %p206_p0 = scmp.ne.s32.totalorder %s149_s6, %s205_s1  ;;  %p211_p2 = scmp.lt.s32.totalorder %s205_s1, %s205_s1 }
   0xd   :  { %p212_p3 = por %p211_p2, %p210_p1 }
   0xe   :  { %181 = vmatpush3.bf16.msra.mxu0 %v200_v4 }
   0xf   :  { %182 = vmatprep.subr.bf16.mxu0 %v229_v1  ;;  %p213_p4 = pnand %p212_p3, %p206_p0 }
  0x12   :  { %183 = vmatpush3.bf16.msra.mxu0 %v201_v5 }
  0x13   :  { %184 = vmatprep.subr.bf16.mxu0 %v229_v1 }
  0x16   :  { %185 = vmatpush3.bf16.msra.mxu0 %v202_v6 }
  0x17   :  { %186 = vmatprep.subr.bf16.mxu0 %v229_v1 }
  0x1a   :  { %187 = vmatpush3.bf16.msra.mxu0 %v203_v7 }
  0x1b   :  { %188 = vmatprep.subr.bf16.mxu0 %v229_v1 }
  0x1e   :  { %189 = vmatpush3.bf16.msra.mxu0 %v204_v8 }
  0x21   :  { %191 = vmatmul.mubr.bf16.vlgmr.msra.gmra.mrb[0].mxu0 %v22_v9 }
  0xf4   :  { %v121_v11 = vpop.f32.mrb[0].mxu0 }
  0xf5   :  { %v140_v12 = vadd.f32 %v164_v10, %v121_v11  ;;  %v192_v13 = vpop.f32.mrb[1].mxu0 }
  0xf6   :  { %v124_v14 = vpop.f32.mrb[2].mxu0 }
  0xf7   :  { %141 = vst [vmem:[#allocation3] sm:$0xff] %v140_v12  ;;  %v193_v15 = vpop.f32.mrb[3].mxu0 }
  0xf8   :  { %216 = shalt.err (!%p213_p4)
}
  0xf9   :  { %s217_s2 = scalar_lea.hbm %s297_s3, 128 }
  0xfa   :  { %p218_p5 = scmp.ne.s32.totalorder %s297_s3, %s217_s2  ;;  %p221_p6 = scmp.lt.u32.totalorder %s217_s2, %s297_s3 }
  0xfc   :  { %p223_p7 = pnand %p221_p6, %p218_p5 }
  0xfe   :  { %226 = shalt.err (!%p223_p7)
}
  0xff   :  { %151 = dma.vmem_to_hbm [thread:$0]  %s149_s6, 128, %s297_s3, [#allocation4]  }
 0x100   :  { %227 = dma.done.wait [#allocation4], 128  }
 0x101   :  { %228 = vsyncadd [#allocation4], 4294967168 }
 0x102   :  { %155 = vsyncpa [#allocation4], 1 }

</bundles_post_ra>
